<compile_context>
chip_gen: v7x
topology: tpu7x:2x2x1
jax: 0.10.0
libtpu: 0.0.40
codegen_flags: <defaults>
</compile_context>

<pallas_src>
import functools

import jax
import jax.numpy as jnp
from jax import lax
from jax.experimental import pallas as pl
from jax.experimental.pallas import tpu as pltpu

MARGIN = 0.5          # MarginRankingLoss margin
PDIST_EPS = 1e-6      # nn.PairwiseDistance default eps (added to the difference)
_MXU_MASKED_SUM_MIN_D = 1024   # use dist@L on the MXU only when D is large


def overall_loss_kernel(mi_ref, mlab_ref, feat_ref, cls_ref, clab_col_ref,
                        clab_row_ref, out_ref, *, n, tm):
    f32 = jnp.float32
    fdt = feat_ref.dtype
    D = feat_ref.shape[1]
    nf = f32(n)
    dn_feat = (((1,), (1,)), ((), ()))      # contract the feature (lane) dim

    i = pl.program_id(0)
    row0 = pl.multiple_of(i * tm, tm)       # block start within the clip half

    # ---------------- loss 2: triplet partial for this row block --------------
    # clip features stay resident across grid steps (constant index_map)
    F_all = feat_ref[pl.ds(n, n), :]                       # [n, D] native dtype
    F_blk = feat_ref[pl.ds(n + row0, tm), :]               # [tm, D] native dtype

    gram = lax.dot_general(F_blk, F_all, dn_feat,
                           preferred_element_type=f32)     # [tm, n] (MXU)
    Fb32 = F_blk.astype(f32)
    sq_blk = jnp.sum(Fb32 * Fb32, axis=1, keepdims=True)   # [tm, 1]
    # Row vector of all squared norms. A [n,1]->[1,n] relayout would be cheaper
    # but is the riskiest op to lower; this mat-vec is <= 8/tm of gram's MXU
    # work and known-good.
    Fa32 = F_all.astype(f32)
    sq_row = lax.dot_general(jnp.ones((1, D), f32), Fa32 * Fa32, dn_feat,
                             preferred_element_type=f32)   # [1, n]
    dist = jnp.sqrt(jnp.maximum(sq_blk + sq_row - 2.0 * gram, 1e-10))  # [tm,n]

    clab_row = clab_row_ref[...]                           # [1, n] f32
    lab_blk = clab_col_ref[pl.ds(row0, tm), :].astype(f32)  # [tm, 1]
    cnt1 = jnp.sum(clab_row, keepdims=True)                # (1,1)
    cnt0 = nf - cnt1

    if D >= _MXU_MASKED_SUM_MIN_D:
        # big-D: masked row sums as one [tm,n]x[n,2] matmul (MXU)
        L = (lax.broadcasted_iota(jnp.int32, (n, 2), 1)
             == clab_col_ref[...]).astype(f32)             # [n, 2]
        S = lax.dot_general(dist, L, (((1,), (0,)), ((), ())),
                            preferred_element_type=f32)    # [tm, 2]
        s0, s1 = S[:, 0:1], S[:, 1:2]
    else:
        # small-D: padded N=2 matmul would cost ~256/D of gram; use VPU+XLU.
        s1 = jnp.sum(dist * clab_row, axis=1, keepdims=True)   # [tm, 1]
        s0 = jnp.sum(dist, axis=1, keepdims=True) - s1

    d_ap_sum = lab_blk * s1 + (1.0 - lab_blk) * s0
    d_an_sum = lab_blk * s0 + (1.0 - lab_blk) * s1
    pos_cnt = lab_blk * cnt1 + (1.0 - lab_blk) * cnt0
    neg_cnt = nf - pos_cnt
    hinge = jnp.maximum(d_ap_sum / pos_cnt - d_an_sum / neg_cnt + MARGIN, 0.0)
    trip_part = jnp.sum(hinge, keepdims=True) / nf          # (1,1)

    # per-block lane-dense (1,8,128) tile; wrapper reads [:,0,0] and sums
    out_ref[...] = jnp.broadcast_to(trip_part.reshape(1, 1, 1), out_ref.shape)

    # ---------------- losses 1, 3, 4: first row block only --------------------
    @pl.when(i == 0)
    def _():
        B, C = mi_ref.shape
        # loss 1: NLLLoss(log(p), labels) = -mean(log p[label]); gather first,
        # only B logs and no -inf at non-selected zero probabilities.
        mi = mi_ref[...].astype(f32)
        oh = (lax.broadcasted_iota(jnp.int32, (B, C), 1)
              == mlab_ref[...]).astype(f32)
        picked_p = jnp.sum(oh * mi, axis=1, keepdims=True)             # [B,1]
        loss_nll = -jnp.sum(jnp.log(picked_p), keepdims=True) / f32(B)

        lab = clab_col_ref[...].astype(f32)                            # [n,1]

        # loss 3: CrossEntropy(clip_cls[n:], clip_labels)
        cls2 = cls_ref[pl.ds(n, n), :].astype(f32)                     # [n,2]
        b0, b1 = cls2[:, 0:1], cls2[:, 1:2]
        m2 = jnp.maximum(b0, b1)
        lse = m2 + jnp.log(jnp.exp(b0 - m2) + jnp.exp(b1 - m2))
        picked_l = b0 * (1.0 - lab) + b1 * lab
        loss_ce = jnp.sum(lse - picked_l, keepdims=True) / nf

        # loss 4: instance loss on rows :n
        cls1 = cls_ref[pl.ds(0, n), :].astype(f32)                     # [n,2]
        a0, a1 = cls1[:, 0:1], cls1[:, 1:2]
        m1 = jnp.maximum(a0, a1)
        e0, e1 = jnp.exp(a0 - m1), jnp.exp(a1 - m1)
        inv_z = pl.reciprocal(e0 + e1, approx=True)                    # EUP
        p0, p1 = e0 * inv_z, e1 * inv_z
        dm0 = (a0 >= a1).astype(f32)        # == (p0 >= 0.5), reciprocal-free
        dm1 = (a1 >= a0).astype(f32)

        # class centers via two [1,n]x[n,D] matvecs (MXU), no [n,n] masks
        dn_rows = (((1,), (0,)), ((), ()))
        c1_sum = lax.dot_general(clab_row.astype(fdt), F_all, dn_rows,
                                 preferred_element_type=f32)           # [1,D]
        call_sum = lax.dot_general(jnp.ones((1, n), fdt), F_all, dn_rows,
                                   preferred_element_type=f32)         # [1,D]
        c_minus = (call_sum - c1_sum) / cnt0                           # [1,D]
        c_plus = c1_sum / cnt1                                         # [1,D]

        # PairwiseDistance with eps added to the difference, expanded so no
        # [n,D] broadcast-subtract temporaries are built:
        #   ||x - c + eps||^2 = x.x + c.c + D*eps^2 - 2 x.c + 2*eps*(sum x - sum c)
        X32 = feat_ref[pl.ds(0, n), :].astype(f32)                     # [n,D]
        xsq = jnp.sum(X32 * X32, axis=1, keepdims=True)                # [n,1]
        xsum = jnp.sum(X32, axis=1, keepdims=True)                     # [n,1]
        d_eps2 = float(D) * PDIST_EPS * PDIST_EPS

        def center_dist(c):
            cross = lax.dot_general(X32, c, dn_feat,
                                    preferred_element_type=f32)        # [n,1]
            csq = jnp.sum(c * c, keepdims=True)                        # (1,1)
            csum = jnp.sum(c, keepdims=True)                           # (1,1)
            d2 = (xsq + csq + d_eps2 - 2.0 * cross
                  + 2.0 * PDIST_EPS * (xsum - csum))
            return jnp.sqrt(jnp.maximum(d2, 0.0))

        d_minus = center_dist(c_minus)                                 # [n,1]
        d_plus = center_dist(c_plus)                                   # [n,1]
        mx = jnp.maximum(d_minus, d_plus)
        em, ep = jnp.exp(d_minus - mx), jnp.exp(d_plus - mx)
        inv_s = pl.reciprocal(em + ep, approx=True)
        distance = (em * dm0 + ep * dm1) * inv_s
        loss_inst = jnp.sum(p0 * p1 * distance, keepdims=True) / nf

        extra = (loss_nll + loss_ce + loss_inst).reshape(1, 1, 1)
        out_ref[...] = out_ref[...] + extra


def _pick_row_block(n):
    """Single shot for small n; <=512-row blocks otherwise."""
    if n <= 512:
        return n
    for cand in (512, 256, 128, 64, 32, 16, 8):
        if n % cand == 0:
            return cand
    return n   # TODO(synk): pad/mask ragged n instead of one giant block


def overall_loss(x_train_MI_cls, labels, clip_feature, clip_cls, clip_labels,
                 row_block=None):
    B, C = x_train_MI_cls.shape
    n = clip_labels.shape[0]
    D = clip_feature.shape[1]
    assert clip_feature.shape[0] == 2 * n and clip_cls.shape[0] == 2 * n
    assert n % 8 == 0, "n must be a multiple of 8 (f32 sublane)"
    tm = row_block if row_block is not None else _pick_row_block(n)
    assert n % tm == 0 and tm % 8 == 0
    nb = n // tm

    # glue: label columns / row (one-hots & masks are built in-kernel)
    labels_col = labels.astype(jnp.int32).reshape(B, 1)
    clab_col = clip_labels.astype(jnp.int32).reshape(n, 1)
    clab_row = clip_labels.astype(jnp.float32).reshape(1, n)

    kernel = functools.partial(overall_loss_kernel, n=n, tm=tm)

    def const(shape):
        return pl.BlockSpec(shape, lambda i: (0,) * len(shape))

    grid_spec = pltpu.PrefetchScalarGridSpec(
        num_scalar_prefetch=0,
        grid=(nb,),
        in_specs=[
            const((B, C)),          # x_train_MI_cls
            const((B, 1)),          # labels (int column)
            const((2 * n, D)),      # clip_feature (resident across steps)
            const((2 * n, 2)),      # clip_cls
            const((n, 1)),          # clip_labels (int column)
            const((1, n)),          # clip_labels (f32 row)
        ],
        out_specs=pl.BlockSpec((1, 8, 128), lambda i: (i, 0, 0)),
    )

    # advisory cost estimate (the n^2 sqrt dominates transcendentals)
    f_item = clip_feature.dtype.itemsize
    flops = (2 * n * n * D                  # gram across all row blocks
             + nb * 2 * (n + tm) * D        # per-block squared-norm passes
             + 8 * n * n                    # dist assembly + masked row sums
             + 6 * n * D                    # centers / cross matvecs, instance math
             + 2 * B * C + 32 * n)
    transcendentals = n * n + 8 * n + B     # n^2 sqrt + per-row exp/log/sqrt + B log
    bytes_accessed = (x_train_MI_cls.size * x_train_MI_cls.dtype.itemsize
                      + clip_feature.size * f_item
                      + clip_cls.size * clip_cls.dtype.itemsize
                      + (B + 2 * n) * 4 + nb * 8 * 128 * 4)

    out = pl.pallas_call(
        kernel,
        out_shape=jax.ShapeDtypeStruct((nb, 8, 128), jnp.float32),
        grid_spec=grid_spec,
        compiler_params=pltpu.CompilerParams(
            dimension_semantics=("parallel",)),   # shard row blocks across v7x's 2 TCs
        cost_estimate=pl.CostEstimate(flops=int(flops),
                                      transcendentals=int(transcendentals),
                                      bytes_accessed=int(bytes_accessed)),
    )(x_train_MI_cls, labels_col, clip_feature, clip_cls, clab_col, clab_row)

    # per-block partial losses live at [:, 0, 0]; reduce in the wrapper
    return jnp.sum(out[:, 0, 0])


def overall_loss_ref(x, labels, feat, cls, clab):
    """Plain-JAX reference mirroring the PyTorch forward (for verification)."""
    n = clab.shape[0]
    nll = -jnp.mean(jnp.log(x)[jnp.arange(x.shape[0]), labels])

    F = feat[n:]
    sq = jnp.sum(F ** 2, axis=1, keepdims=True)
    dist = sq + sq.T - 2.0 * F @ F.T
    dist = jnp.sqrt(jnp.clip(dist, 1e-10))
    mask = clab[:, None] == clab[None, :]
    d_ap = jnp.sum(jnp.where(mask, dist, 0.0), axis=1) / jnp.sum(mask, axis=1)
    d_an = jnp.sum(jnp.where(~mask, dist, 0.0), axis=1) / jnp.sum(~mask, axis=1)
    trip = jnp.mean(jnp.maximum(d_ap - d_an + MARGIN, 0.0))

    logits2 = cls[n:]
    ce = jnp.mean(jax.nn.logsumexp(logits2, axis=1) - logits2[jnp.arange(n), clab])

    pred = jax.nn.softmax(cls[:n], axis=1)
    dmask = (pred >= 0.5).astype(jnp.float32)
    fm_m = jnp.mean(F[clab == 0], axis=0, keepdims=True)
    fm_p = jnp.mean(F[clab == 1], axis=0, keepdims=True)
    dmn = jnp.linalg.norm(feat[:n] - fm_m + PDIST_EPS, axis=1)
    dpl = jnp.linalg.norm(feat[:n] - fm_p + PDIST_EPS, axis=1)
    d = jax.nn.softmax(jnp.stack([dmn, dpl]), axis=0)
    d = jnp.sum(d * dmask.T, axis=0)
    inst = jnp.mean(pred[:, 0] * pred[:, 1] * d)
    return nll + trip + ce + inst


if __name__ == "__main__":
    key = jax.random.PRNGKey(0)
    k1, k2, k3, k4 = jax.random.split(key, 4)

    B, C = 4, 4       # MI classifier batch / classes
    n, D = 16, 32     # number of clips / feature dim

    x_train_MI_cls = jax.nn.softmax(
        jax.random.normal(k1, (B, C), dtype=jnp.float32), axis=1)
    labels = jax.random.randint(k2, (B,), 0, C, dtype=jnp.int32)
    clip_feature = jax.random.normal(k3, (2 * n, D), dtype=jnp.float32)
    clip_cls = jax.random.normal(k4, (2 * n, 2), dtype=jnp.float32)
    # deterministic binary labels containing both classes
    clip_labels = jnp.array([0, 1] * (n // 2), dtype=jnp.int32)

    # row_block=8 -> 2-step grid: exercises the tiled triplet path, the dynamic
    # pl.ds row windows, and the block-0 gating of losses 1/3/4.
    out = overall_loss(x_train_MI_cls, labels, clip_feature, clip_cls,
                       clip_labels, row_block=8)
    out = jax.block_until_ready(out)

    ref = overall_loss_ref(x_train_MI_cls, labels, clip_feature, clip_cls,
                           clip_labels)
    assert jnp.isfinite(out), "kernel produced non-finite loss"
    assert abs(float(out) - float(ref)) < 2e-3, (float(out), float(ref))

    print("KERNEL_OK")
</pallas_src>

<mosaic_0001>
module attributes {stable_mosaic.version = 11 : i64} {
  func.func @overall_loss_kernel(%arg0: i32, %arg1: memref<4x4xf32, #tpu.memory_space<vmem>>, %arg2: memref<4x1xi32, #tpu.memory_space<vmem>>, %arg3: memref<32x32xf32, #tpu.memory_space<vmem>>, %arg4: memref<32x2xf32, #tpu.memory_space<vmem>>, %arg5: memref<16x1xi32, #tpu.memory_space<vmem>>, %arg6: memref<1x16xf32, #tpu.memory_space<vmem>>, %arg7: memref<1x8x128xf32, #tpu.memory_space<vmem>>) attributes {dimension_semantics = [#tpu.dimension_semantics<parallel>], iteration_bounds = array<i64: 2>, scalar_prefetch = 0 : i64, scratch_operands = 0 : i64, tpu.core_type = #tpu.core_type<tc>, window_params = [{pipeline_mode = #tpu.pipeline_mode<synchronous>, transform_indices = @transform_0, window_bounds = array<i64: 4, 4>}, {pipeline_mode = #tpu.pipeline_mode<synchronous>, transform_indices = @transform_1, window_bounds = array<i64: 4, 1>}, {pipeline_mode = #tpu.pipeline_mode<synchronous>, transform_indices = @transform_2, window_bounds = array<i64: 32, 32>}, {pipeline_mode = #tpu.pipeline_mode<synchronous>, transform_indices = @transform_3, window_bounds = array<i64: 32, 2>}, {pipeline_mode = #tpu.pipeline_mode<synchronous>, transform_indices = @transform_4, window_bounds = array<i64: 16, 1>}, {pipeline_mode = #tpu.pipeline_mode<synchronous>, transform_indices = @transform_5, window_bounds = array<i64: 1, 16>}, {transform_indices = @transform_6, window_bounds = array<i64: 1, 8, 128>}]} {
    %c8_i32 = arith.constant 8 : i32
    %0 = arith.muli %arg0, %c8_i32 : i32
    %1 = tpu.assume_multiple %0, 8 : i32
    %c16 = arith.constant 16 : index
    %c0 = arith.constant 0 : index
    %2 = vector.load %arg3[%c16, %c0] : memref<32x32xf32, #tpu.memory_space<vmem>>, vector<16x32xf32>
    %c16_i32 = arith.constant 16 : i32
    %3 = arith.addi %c16_i32, %1 : i32
    %4 = arith.index_cast %3 : i32 to index
    %c0_0 = arith.constant 0 : index
    %5 = vector.load %arg3[%4, %c0_0] : memref<32x32xf32, #tpu.memory_space<vmem>>, vector<8x32xf32>
    %cst = arith.constant dense<0.000000e+00> : vector<8x16xf32>
    %6 = tpu.matmul %5, %2, %cst {dimension_numbers = #tpu.dot_dimension_numbers<[1], [1], [0], [0], [0, 0, 1, 0], [], []>} : vector<8x32xf32>, vector<16x32xf32>, vector<8x16xf32> -> vector<8x16xf32>
    %7 = arith.mulf %5, %5 : vector<8x32xf32>
    %cst_1 = arith.constant dense<0.000000e+00> : vector<8xf32>
    %8 = vector.multi_reduction <add>, %7, %cst_1 [1] : vector<8x32xf32> to vector<8xf32>
    %9 = vector.shape_cast %8 : vector<8xf32> to vector<8x1xf32>
    %cst_2 = arith.constant 1.000000e+00 : f32
    %10 = vector.broadcast %cst_2 : f32 to vector<1x32xf32>
    %11 = arith.mulf %2, %2 : vector<16x32xf32>
    %cst_3 = arith.constant dense<0.000000e+00> : vector<1x16xf32>
    %12 = tpu.matmul %10, %11, %cst_3 {dimension_numbers = #tpu.dot_dimension_numbers<[1], [1], [0], [0], [0, 0, 1, 0], [], []>} : vector<1x32xf32>, vector<16x32xf32>, vector<1x16xf32> -> vector<1x16xf32>
    %13 = vector.broadcast %9 : vector<8x1xf32> to vector<8x16xf32>
    %14 = vector.broadcast %12 : vector<1x16xf32> to vector<8x16xf32>
    %15 = arith.addf %13, %14 : vector<8x16xf32>
    %cst_4 = arith.constant 2.000000e+00 : f32
    %16 = vector.broadcast %cst_4 : f32 to vector<8x16xf32>
    %17 = arith.mulf %16, %6 : vector<8x16xf32>
    %18 = arith.subf %15, %17 : vector<8x16xf32>
    %cst_5 = arith.constant 1.000000e-10 : f32
    %19 = vector.broadcast %cst_5 : f32 to vector<8x16xf32>
    %20 = arith.maximumf %18, %19 : vector<8x16xf32>
    %21 = math.sqrt %20 : vector<8x16xf32>
    %c0_6 = arith.constant 0 : index
    %c0_7 = arith.constant 0 : index
    %22 = vector.load %arg6[%c0_6, %c0_7] : memref<1x16xf32, #tpu.memory_space<vmem>>, vector<1x16xf32>
    %23 = arith.index_cast %1 : i32 to index
    %c0_8 = arith.constant 0 : index
    %24 = vector.load %arg5[%23, %c0_8] : memref<16x1xi32, #tpu.memory_space<vmem>>, vector<8x1xi32>
    %25 = arith.sitofp %24 : vector<8x1xi32> to vector<8x1xf32>
    %26 = vector.shape_cast %22 : vector<1x16xf32> to vector<1x1x16xf32>
    %cst_9 = arith.constant dense<0.000000e+00> : vector<1xf32>
    %27 = vector.multi_reduction <add>, %26, %cst_9 [1, 2] : vector<1x1x16xf32> to vector<1xf32>
    %28 = vector.shape_cast %27 : vector<1xf32> to vector<1x1x1xf32>
    %29 = vector.extract %28[0, 0, 0] : f32 from vector<1x1x1xf32>
    %30 = vector.broadcast %29 : f32 to vector<1x1xf32>
    %cst_10 = arith.constant 1.600000e+01 : f32
    %31 = vector.broadcast %cst_10 : f32 to vector<1x1xf32>
    %32 = arith.subf %31, %30 : vector<1x1xf32>
    %33 = vector.broadcast %22 : vector<1x16xf32> to vector<8x16xf32>
    %34 = arith.mulf %21, %33 : vector<8x16xf32>
    %cst_11 = arith.constant dense<0.000000e+00> : vector<8xf32>
    %35 = vector.multi_reduction <add>, %34, %cst_11 [1] : vector<8x16xf32> to vector<8xf32>
    %36 = vector.shape_cast %35 : vector<8xf32> to vector<8x1xf32>
    %cst_12 = arith.constant dense<0.000000e+00> : vector<8xf32>
    %37 = vector.multi_reduction <add>, %21, %cst_12 [1] : vector<8x16xf32> to vector<8xf32>
    %38 = vector.shape_cast %37 : vector<8xf32> to vector<8x1xf32>
    %39 = arith.subf %38, %36 : vector<8x1xf32>
    %40 = arith.mulf %25, %36 : vector<8x1xf32>
    %cst_13 = arith.constant 1.000000e+00 : f32
    %41 = vector.broadcast %cst_13 : f32 to vector<8x1xf32>
    %42 = arith.subf %41, %25 : vector<8x1xf32>
    %43 = arith.mulf %42, %39 : vector<8x1xf32>
    %44 = arith.addf %40, %43 : vector<8x1xf32>
    %45 = arith.mulf %25, %39 : vector<8x1xf32>
    %cst_14 = arith.constant 1.000000e+00 : f32
    %46 = vector.broadcast %cst_14 : f32 to vector<8x1xf32>
    %47 = arith.subf %46, %25 : vector<8x1xf32>
    %48 = arith.mulf %47, %36 : vector<8x1xf32>
    %49 = arith.addf %45, %48 : vector<8x1xf32>
    %50 = vector.broadcast %30 : vector<1x1xf32> to vector<8x1xf32>
    %51 = arith.mulf %25, %50 : vector<8x1xf32>
    %cst_15 = arith.constant 1.000000e+00 : f32
    %52 = vector.broadcast %cst_15 : f32 to vector<8x1xf32>
    %53 = arith.subf %52, %25 : vector<8x1xf32>
    %54 = vector.broadcast %32 : vector<1x1xf32> to vector<8x1xf32>
    %55 = arith.mulf %53, %54 : vector<8x1xf32>
    %56 = arith.addf %51, %55 : vector<8x1xf32>
    %cst_16 = arith.constant 1.600000e+01 : f32
    %57 = vector.broadcast %cst_16 : f32 to vector<8x1xf32>
    %58 = arith.subf %57, %56 : vector<8x1xf32>
    %59 = arith.divf %44, %56 : vector<8x1xf32>
    %60 = arith.divf %49, %58 : vector<8x1xf32>
    %61 = arith.subf %59, %60 : vector<8x1xf32>
    %cst_17 = arith.constant 5.000000e-01 : f32
    %62 = vector.broadcast %cst_17 : f32 to vector<8x1xf32>
    %63 = arith.addf %61, %62 : vector<8x1xf32>
    %cst_18 = arith.constant 0.000000e+00 : f32
    %64 = vector.broadcast %cst_18 : f32 to vector<8x1xf32>
    %65 = arith.maximumf %63, %64 : vector<8x1xf32>
    %66 = vector.shape_cast %65 : vector<8x1xf32> to vector<1x8x1xf32>
    %cst_19 = arith.constant dense<0.000000e+00> : vector<1xf32>
    %67 = vector.multi_reduction <add>, %66, %cst_19 [1, 2] : vector<1x8x1xf32> to vector<1xf32>
    %68 = vector.shape_cast %67 : vector<1xf32> to vector<1x1x1xf32>
    %69 = vector.extract %68[0, 0, 0] : f32 from vector<1x1x1xf32>
    %70 = vector.broadcast %69 : f32 to vector<1x1xf32>
    %cst_20 = arith.constant 1.600000e+01 : f32
    %71 = vector.broadcast %cst_20 : f32 to vector<1x1xf32>
    %72 = arith.divf %70, %71 : vector<1x1xf32>
    %73 = vector.shape_cast %72 : vector<1x1xf32> to vector<1x1x1xf32>
    %74 = vector.shape_cast %73 : vector<1x1x1xf32> to vector<1x1x1xf32>
    %75 = vector.broadcast %74 : vector<1x1x1xf32> to vector<1x8x128xf32>
    %c0_21 = arith.constant 0 : index
    %c0_22 = arith.constant 0 : index
    %c0_23 = arith.constant 0 : index
    %76 = vector.load %arg7[%c0_21, %c0_22, %c0_23] : memref<1x8x128xf32, #tpu.memory_space<vmem>>, vector<1x8x128xf32>
    tpu.vector_store %arg7[%c0_21, %c0_22, %c0_23], %75 {strides = array<i32>} : memref<1x8x128xf32, #tpu.memory_space<vmem>>, vector<1x8x128xf32>,
    %c0_i32 = arith.constant 0 : i32
    %77 = arith.cmpi eq, %arg0, %c0_i32 : i32
    %78 = arith.extui %77 : i1 to i32
    %cst_24 = arith.constant 1.600000e+01 : f32
    %c0_i32_25 = arith.constant 0 : i32
    %79 = arith.cmpi ne, %78, %c0_i32_25 : i32
    scf.if %79 {
      %c0_26 = arith.constant 0 : index
      %c0_27 = arith.constant 0 : index
      %80 = vector.load %arg1[%c0_26, %c0_27] : memref<4x4xf32, #tpu.memory_space<vmem>>, vector<4x4xf32>
      %81 = tpu.iota {dimensions = array<i32: 1>} : vector<4x4xi32>
      %c0_28 = arith.constant 0 : index
      %c0_29 = arith.constant 0 : index
      %82 = vector.load %arg2[%c0_28, %c0_29] : memref<4x1xi32, #tpu.memory_space<vmem>>, vector<4x1xi32>
      %83 = vector.broadcast %82 : vector<4x1xi32> to vector<4x4xi32>
      %84 = arith.cmpi eq, %81, %83 : vector<4x4xi32>
      %85 = arith.extui %84 : vector<4x4xi1> to vector<4x4xi32>
      %86 = arith.sitofp %85 : vector<4x4xi32> to vector<4x4xf32>
      %87 = arith.mulf %86, %80 : vector<4x4xf32>
      %cst_30 = arith.constant dense<0.000000e+00> : vector<4xf32>
      %88 = vector.multi_reduction <add>, %87, %cst_30 [1] : vector<4x4xf32> to vector<4xf32>
      %89 = vector.shape_cast %88 : vector<4xf32> to vector<4x1xf32>
      %90 = math.log %89 : vector<4x1xf32>
      %91 = vector.shape_cast %90 : vector<4x1xf32> to vector<1x4x1xf32>
      %cst_31 = arith.constant dense<0.000000e+00> : vector<1xf32>
      %92 = vector.multi_reduction <add>, %91, %cst_31 [1, 2] : vector<1x4x1xf32> to vector<1xf32>
      %93 = vector.shape_cast %92 : vector<1xf32> to vector<1x1x1xf32>
      %94 = vector.extract %93[0, 0, 0] : f32 from vector<1x1x1xf32>
      %95 = vector.broadcast %94 : f32 to vector<1x1xf32>
      %cst_32 = arith.constant 0.000000e+00 : f32
      %96 = vector.broadcast %cst_32 : f32 to vector<1x1xf32>
      %97 = arith.subf %96, %95 : vector<1x1xf32>
      %cst_33 = arith.constant 4.000000e+00 : f32
      %98 = vector.broadcast %cst_33 : f32 to vector<1x1xf32>
      %99 = arith.divf %97, %98 : vector<1x1xf32>
      %c0_34 = arith.constant 0 : index
      %c0_35 = arith.constant 0 : index
      %100 = vector.load %arg5[%c0_34, %c0_35] : memref<16x1xi32, #tpu.memory_space<vmem>>, vector<16x1xi32>
      %101 = arith.sitofp %100 : vector<16x1xi32> to vector<16x1xf32>
      %c16_36 = arith.constant 16 : index
      %c0_37 = arith.constant 0 : index
      %102 = vector.load %arg4[%c16_36, %c0_37] : memref<32x2xf32, #tpu.memory_space<vmem>>, vector<16x2xf32>
      %103 = vector.extract_strided_slice %102 {offsets = [0, 0], sizes = [16, 1], strides = [1, 1]} : vector<16x2xf32> to vector<16x1xf32>
      %104 = vector.extract_strided_slice %102 {offsets = [0, 1], sizes = [16, 1], strides = [1, 1]} : vector<16x2xf32> to vector<16x1xf32>
      %105 = arith.maximumf %103, %104 : vector<16x1xf32>
      %106 = arith.subf %103, %105 : vector<16x1xf32>
      %107 = math.exp %106 : vector<16x1xf32>
      %108 = arith.subf %104, %105 : vector<16x1xf32>
      %109 = math.exp %108 : vector<16x1xf32>
      %110 = arith.addf %107, %109 : vector<16x1xf32>
      %111 = math.log %110 : vector<16x1xf32>
      %112 = arith.addf %105, %111 : vector<16x1xf32>
      %cst_38 = arith.constant 1.000000e+00 : f32
      %113 = vector.broadcast %cst_38 : f32 to vector<16x1xf32>
      %114 = arith.subf %113, %101 : vector<16x1xf32>
      %115 = arith.mulf %103, %114 : vector<16x1xf32>
      %116 = arith.mulf %104, %101 : vector<16x1xf32>
      %117 = arith.addf %115, %116 : vector<16x1xf32>
      %118 = arith.subf %112, %117 : vector<16x1xf32>
      %119 = vector.shape_cast %118 : vector<16x1xf32> to vector<1x16x1xf32>
      %cst_39 = arith.constant dense<0.000000e+00> : vector<1xf32>
      %120 = vector.multi_reduction <add>, %119, %cst_39 [1, 2] : vector<1x16x1xf32> to vector<1xf32>
      %121 = vector.shape_cast %120 : vector<1xf32> to vector<1x1x1xf32>
      %122 = vector.extract %121[0, 0, 0] : f32 from vector<1x1x1xf32>
      %123 = vector.broadcast %122 : f32 to vector<1x1xf32>
      %124 = vector.broadcast %cst_24 : f32 to vector<1x1xf32>
      %125 = arith.divf %123, %124 : vector<1x1xf32>
      %c0_40 = arith.constant 0 : index
      %c0_41 = arith.constant 0 : index
      %126 = vector.load %arg4[%c0_40, %c0_41] : memref<32x2xf32, #tpu.memory_space<vmem>>, vector<16x2xf32>
      %127 = vector.extract_strided_slice %126 {offsets = [0, 0], sizes = [16, 1], strides = [1, 1]} : vector<16x2xf32> to vector<16x1xf32>
      %128 = vector.extract_strided_slice %126 {offsets = [0, 1], sizes = [16, 1], strides = [1, 1]} : vector<16x2xf32> to vector<16x1xf32>
      %129 = arith.maximumf %127, %128 : vector<16x1xf32>
      %130 = arith.subf %127, %129 : vector<16x1xf32>
      %131 = math.exp %130 : vector<16x1xf32>
      %132 = arith.subf %128, %129 : vector<16x1xf32>
      %133 = math.exp %132 : vector<16x1xf32>
      %134 = arith.addf %131, %133 : vector<16x1xf32>
      %135 = tpu.reciprocal %134 {approx = true} : vector<16x1xf32> -> vector<16x1xf32>
      %136 = arith.mulf %131, %135 : vector<16x1xf32>
      %137 = arith.mulf %133, %135 : vector<16x1xf32>
      %138 = arith.cmpf oge, %127, %128 : vector<16x1xf32>
      %139 = arith.extui %138 : vector<16x1xi1> to vector<16x1xi32>
      %140 = arith.sitofp %139 : vector<16x1xi32> to vector<16x1xf32>
      %141 = arith.cmpf oge, %128, %127 : vector<16x1xf32>
      %142 = arith.extui %141 : vector<16x1xi1> to vector<16x1xi32>
      %143 = arith.sitofp %142 : vector<16x1xi32> to vector<16x1xf32>
      %cst_42 = arith.constant dense<0.000000e+00> : vector<1x32xf32>
      %144 = tpu.matmul %22, %2, %cst_42 {dimension_numbers = #tpu.dot_dimension_numbers<[1], [0], [0], [1], [0, 0, 1, 1], [], []>} : vector<1x16xf32>, vector<16x32xf32>, vector<1x32xf32> -> vector<1x32xf32>
      %cst_43 = arith.constant 1.000000e+00 : f32
      %145 = vector.broadcast %cst_43 : f32 to vector<1x16xf32>
      %cst_44 = arith.constant dense<0.000000e+00> : vector<1x32xf32>
      %146 = tpu.matmul %145, %2, %cst_44 {dimension_numbers = #tpu.dot_dimension_numbers<[1], [0], [0], [1], [0, 0, 1, 1], [], []>} : vector<1x16xf32>, vector<16x32xf32>, vector<1x32xf32> -> vector<1x32xf32>
      %147 = arith.subf %146, %144 : vector<1x32xf32>
      %148 = vector.broadcast %32 : vector<1x1xf32> to vector<1x32xf32>
      %149 = arith.divf %147, %148 : vector<1x32xf32>
      %150 = vector.broadcast %30 : vector<1x1xf32> to vector<1x32xf32>
      %151 = arith.divf %144, %150 : vector<1x32xf32>
      %c0_45 = arith.constant 0 : index
      %c0_46 = arith.constant 0 : index
      %152 = vector.load %arg3[%c0_45, %c0_46] : memref<32x32xf32, #tpu.memory_space<vmem>>, vector<16x32xf32>
      %153 = arith.mulf %152, %152 : vector<16x32xf32>
      %cst_47 = arith.constant dense<0.000000e+00> : vector<16xf32>
      %154 = vector.multi_reduction <add>, %153, %cst_47 [1] : vector<16x32xf32> to vector<16xf32>
      %155 = vector.shape_cast %154 : vector<16xf32> to vector<16x1xf32>
      %cst_48 = arith.constant dense<0.000000e+00> : vector<16xf32>
      %156 = vector.multi_reduction <add>, %152, %cst_48 [1] : vector<16x32xf32> to vector<16xf32>
      %157 = vector.shape_cast %156 : vector<16xf32> to vector<16x1xf32>
      %cst_49 = arith.constant dense<0.000000e+00> : vector<16x1xf32>
      %158 = tpu.matmul %152, %149, %cst_49 {dimension_numbers = #tpu.dot_dimension_numbers<[1], [1], [0], [0], [0, 0, 1, 0], [], []>} : vector<16x32xf32>, vector<1x32xf32>, vector<16x1xf32> -> vector<16x1xf32>
      %159 = arith.mulf %149, %149 : vector<1x32xf32>
      %160 = vector.shape_cast %159 : vector<1x32xf32> to vector<1x1x32xf32>
      %cst_50 = arith.constant dense<0.000000e+00> : vector<1xf32>
      %161 = vector.multi_reduction <add>, %160, %cst_50 [1, 2] : vector<1x1x32xf32> to vector<1xf32>
      %162 = vector.shape_cast %161 : vector<1xf32> to vector<1x1x1xf32>
      %163 = vector.extract %162[0, 0, 0] : f32 from vector<1x1x1xf32>
      %164 = vector.broadcast %163 : f32 to vector<1x1xf32>
      %165 = vector.shape_cast %149 : vector<1x32xf32> to vector<1x1x32xf32>
      %cst_51 = arith.constant dense<0.000000e+00> : vector<1xf32>
      %166 = vector.multi_reduction <add>, %165, %cst_51 [1, 2] : vector<1x1x32xf32> to vector<1xf32>
      %167 = vector.shape_cast %166 : vector<1xf32> to vector<1x1x1xf32>
      %168 = vector.extract %167[0, 0, 0] : f32 from vector<1x1x1xf32>
      %169 = vector.broadcast %168 : f32 to vector<1x1xf32>
      %170 = vector.broadcast %164 : vector<1x1xf32> to vector<16x1xf32>
      %171 = arith.addf %155, %170 : vector<16x1xf32>
      %cst_52 = arith.constant 3.200000e-11 : f32
      %172 = vector.broadcast %cst_52 : f32 to vector<16x1xf32>
      %173 = arith.addf %171, %172 : vector<16x1xf32>
      %cst_53 = arith.constant 2.000000e+00 : f32
      %174 = vector.broadcast %cst_53 : f32 to vector<16x1xf32>
      %175 = arith.mulf %174, %158 : vector<16x1xf32>
      %176 = arith.subf %173, %175 : vector<16x1xf32>
      %177 = vector.broadcast %169 : vector<1x1xf32> to vector<16x1xf32>
      %178 = arith.subf %157, %177 : vector<16x1xf32>
      %cst_54 = arith.constant 2.000000e-06 : f32
      %179 = vector.broadcast %cst_54 : f32 to vector<16x1xf32>
      %180 = arith.mulf %179, %178 : vector<16x1xf32>
      %181 = arith.addf %176, %180 : vector<16x1xf32>
      %cst_55 = arith.constant 0.000000e+00 : f32
      %182 = vector.broadcast %cst_55 : f32 to vector<16x1xf32>
      %183 = arith.maximumf %181, %182 : vector<16x1xf32>
      %184 = math.sqrt %183 : vector<16x1xf32>
      %cst_56 = arith.constant dense<0.000000e+00> : vector<16x1xf32>
      %185 = tpu.matmul %152, %151, %cst_56 {dimension_numbers = #tpu.dot_dimension_numbers<[1], [1], [0], [0], [0, 0, 1, 0], [], []>} : vector<16x32xf32>, vector<1x32xf32>, vector<16x1xf32> -> vector<16x1xf32>
      %186 = arith.mulf %151, %151 : vector<1x32xf32>
      %187 = vector.shape_cast %186 : vector<1x32xf32> to vector<1x1x32xf32>
      %cst_57 = arith.constant dense<0.000000e+00> : vector<1xf32>
      %188 = vector.multi_reduction <add>, %187, %cst_57 [1, 2] : vector<1x1x32xf32> to vector<1xf32>
      %189 = vector.shape_cast %188 : vector<1xf32> to vector<1x1x1xf32>
      %190 = vector.extract %189[0, 0, 0] : f32 from vector<1x1x1xf32>
      %191 = vector.broadcast %190 : f32 to vector<1x1xf32>
      %192 = vector.shape_cast %151 : vector<1x32xf32> to vector<1x1x32xf32>
      %cst_58 = arith.constant dense<0.000000e+00> : vector<1xf32>
      %193 = vector.multi_reduction <add>, %192, %cst_58 [1, 2] : vector<1x1x32xf32> to vector<1xf32>
      %194 = vector.shape_cast %193 : vector<1xf32> to vector<1x1x1xf32>
      %195 = vector.extract %194[0, 0, 0] : f32 from vector<1x1x1xf32>
      %196 = vector.broadcast %195 : f32 to vector<1x1xf32>
      %197 = vector.broadcast %191 : vector<1x1xf32> to vector<16x1xf32>
      %198 = arith.addf %155, %197 : vector<16x1xf32>
      %cst_59 = arith.constant 3.200000e-11 : f32
      %199 = vector.broadcast %cst_59 : f32 to vector<16x1xf32>
      %200 = arith.addf %198, %199 : vector<16x1xf32>
      %cst_60 = arith.constant 2.000000e+00 : f32
      %201 = vector.broadcast %cst_60 : f32 to vector<16x1xf32>
      %202 = arith.mulf %201, %185 : vector<16x1xf32>
      %203 = arith.subf %200, %202 : vector<16x1xf32>
      %204 = vector.broadcast %196 : vector<1x1xf32> to vector<16x1xf32>
      %205 = arith.subf %157, %204 : vector<16x1xf32>
      %cst_61 = arith.constant 2.000000e-06 : f32
      %206 = vector.broadcast %cst_61 : f32 to vector<16x1xf32>
      %207 = arith.mulf %206, %205 : vector<16x1xf32>
      %208 = arith.addf %203, %207 : vector<16x1xf32>
      %cst_62 = arith.constant 0.000000e+00 : f32
      %209 = vector.broadcast %cst_62 : f32 to vector<16x1xf32>
      %210 = arith.maximumf %208, %209 : vector<16x1xf32>
      %211 = math.sqrt %210 : vector<16x1xf32>
      %212 = arith.maximumf %184, %211 : vector<16x1xf32>
      %213 = arith.subf %184, %212 : vector<16x1xf32>
      %214 = math.exp %213 : vector<16x1xf32>
      %215 = arith.subf %211, %212 : vector<16x1xf32>
      %216 = math.exp %215 : vector<16x1xf32>
      %217 = arith.addf %214, %216 : vector<16x1xf32>
      %218 = tpu.reciprocal %217 {approx = true} : vector<16x1xf32> -> vector<16x1xf32>
      %219 = arith.mulf %214, %140 : vector<16x1xf32>
      %220 = arith.mulf %216, %143 : vector<16x1xf32>
      %221 = arith.addf %219, %220 : vector<16x1xf32>
      %222 = arith.mulf %221, %218 : vector<16x1xf32>
      %223 = arith.mulf %136, %137 : vector<16x1xf32>
      %224 = arith.mulf %223, %222 : vector<16x1xf32>
      %225 = vector.shape_cast %224 : vector<16x1xf32> to vector<1x16x1xf32>
      %cst_63 = arith.constant dense<0.000000e+00> : vector<1xf32>
      %226 = vector.multi_reduction <add>, %225, %cst_63 [1, 2] : vector<1x16x1xf32> to vector<1xf32>
      %227 = vector.shape_cast %226 : vector<1xf32> to vector<1x1x1xf32>
      %228 = vector.extract %227[0, 0, 0] : f32 from vector<1x1x1xf32>
      %229 = vector.broadcast %228 : f32 to vector<1x1xf32>
      %230 = vector.broadcast %cst_24 : f32 to vector<1x1xf32>
      %231 = arith.divf %229, %230 : vector<1x1xf32>
      %232 = arith.addf %99, %125 : vector<1x1xf32>
      %233 = arith.addf %232, %231 : vector<1x1xf32>
      %234 = vector.shape_cast %233 : vector<1x1xf32> to vector<1x1x1xf32>
      %c0_64 = arith.constant 0 : index
      %c0_65 = arith.constant 0 : index
      %c0_66 = arith.constant 0 : index
      %235 = vector.load %arg7[%c0_64, %c0_65, %c0_66] : memref<1x8x128xf32, #tpu.memory_space<vmem>>, vector<1x8x128xf32>
      %236 = vector.broadcast %234 : vector<1x1x1xf32> to vector<1x8x128xf32>
      %237 = arith.addf %235, %236 : vector<1x8x128xf32>
      %c0_67 = arith.constant 0 : index
      %c0_68 = arith.constant 0 : index
      %c0_69 = arith.constant 0 : index
      %238 = vector.load %arg7[%c0_67, %c0_68, %c0_69] : memref<1x8x128xf32, #tpu.memory_space<vmem>>, vector<1x8x128xf32>
      tpu.vector_store %arg7[%c0_67, %c0_68, %c0_69], %237 {strides = array<i32>} : memref<1x8x128xf32, #tpu.memory_space<vmem>>, vector<1x8x128xf32>,
    } else {
    }
    return
  }
  func.func @transform_0(%arg0: i32) -> (i32, i32) {
    %c0_i32 = arith.constant 0 : i32
    %c0_i32_0 = arith.constant 0 : i32
    %c0_i32_1 = arith.constant 0 : i32
    return %c0_i32, %c0_i32_0 : i32, i32
  }
  func.func @transform_1(%arg0: i32) -> (i32, i32) {
    %c0_i32 = arith.constant 0 : i32
    %c0_i32_0 = arith.constant 0 : i32
    %c0_i32_1 = arith.constant 0 : i32
    return %c0_i32, %c0_i32_0 : i32, i32
  }
  func.func @transform_2(%arg0: i32) -> (i32, i32) {
    %c0_i32 = arith.constant 0 : i32
    %c0_i32_0 = arith.constant 0 : i32
    %c0_i32_1 = arith.constant 0 : i32
    return %c0_i32, %c0_i32_0 : i32, i32
  }
  func.func @transform_3(%arg0: i32) -> (i32, i32) {
    %c0_i32 = arith.constant 0 : i32
    %c0_i32_0 = arith.constant 0 : i32
    %c0_i32_1 = arith.constant 0 : i32
    return %c0_i32, %c0_i32_0 : i32, i32
  }
  func.func @transform_4(%arg0: i32) -> (i32, i32) {
    %c0_i32 = arith.constant 0 : i32
    %c0_i32_0 = arith.constant 0 : i32
    %c0_i32_1 = arith.constant 0 : i32
    return %c0_i32, %c0_i32_0 : i32, i32
  }
  func.func @transform_5(%arg0: i32) -> (i32, i32) {
    %c0_i32 = arith.constant 0 : i32
    %c0_i32_0 = arith.constant 0 : i32
    %c0_i32_1 = arith.constant 0 : i32
    return %c0_i32, %c0_i32_0 : i32, i32
  }
  func.func @transform_6(%arg0: i32) -> (i32, i32, i32) {
    %c0_i32 = arith.constant 0 : i32
    %c0_i32_0 = arith.constant 0 : i32
    %c0_i32_1 = arith.constant 0 : i32
    return %arg0, %c0_i32, %c0_i32_0 : i32, i32, i32
  }
}

</mosaic_0001>

<bundles_post_ra>
// kernel: tpu_custom_call.1
= control target key start
LH: loop header
LB: loop body
LE: loop exit
PB: predicated region body
PF: predicated region fallthrough
CT: control target
= control target key end

     0   :  { %11 = vsyncpa [#allocation3], 0  ;;  %s1762_s0 = inlined_call_operand.vmem [shape: f32[4,4], index: 0, kind: input, shape index: {}]   ;;  %s1763_s1 = inlined_call_operand.vmem [shape: s32[4,1], index: 1, kind: input, shape index: {}]   ;;  %s1764_s2 = inlined_call_operand.vmem [shape: f32[32,32], index: 2, kind: input, shape index: {}]   ;;  %s1765_s3 = inlined_call_operand.vmem [shape: f32[32,2], index: 3, kind: input, shape index: {}]   ;;  %s1766_s4 = inlined_call_operand.vmem [shape: s32[16,1], index: 4, kind: input, shape index: {}]   ;;  %s1767_s5 = inlined_call_operand.vmem [shape: f32[1,16], index: 5, kind: input, shape index: {}]   ;;  %s1768_s6 = inlined_call_operand.hbm [shape: f32[2,8,128], index: 6, kind: output, shape index: {}]  }
   0x1   :  { %13 = vsyncpa [#allocation3 + $0x1], 0  ;;  %s1426_s21 = smov 0   ;;  %s1428_s22 = smov 0  }
   0x2   :  { %s1430_s23 = smov 0   ;;  %s1432_s24 = smov 0  }
   0x3 LB: > { %s1447_s25 = sadd.s32 4294967295, %s1377_s24   ;;  %s1110_s26 = sadd.s32 4294967294, %s1377_s24   ;;  %s1377_s24 = sphi %s1432_s24, %s1774_s24   ;;  %s1373_s23 = sphi %s1430_s23, %s1773_s23   ;;  %s1369_s22 = sphi %s1428_s22, %s1772_s22   ;;  %s1365_s21 = sphi %s1426_s21, %s1771_s21  }
   0x4   : > { %s1451_s27 = sadd.s32 1, %s1377_s24   ;;  %s152_s28 = sadd.s32 1, %s1373_s23 }
   0x5   : > { %s149_s29 = ssub.s32 %s1377_s24, %s1451_s27  ;;  %p162_p0 = scmp.ne.s32.totalorder %s1373_s23, %s1369_s22 }
   0x6   : > { %p150_p1 = scmp.eq.s32.totalorder %s149_s29, 0  ;;  %p163_p2 = scmp.eq.s32.totalorder %s1447_s25, 1 }
   0x7   : > { %p168_p3 = scmp.ne.s32.totalorder %s1369_s22, %s1365_s21  ;;  %p169_p4 = scmp.eq.s32.totalorder %s1110_s26, 1 }
   0x8   : > { %s1462_s30 = scalar_select %p150_p1, %s1373_s23, %s152_s28  }
   0x9   : > { %p1464_p5 = por %p163_p2, %p162_p0  ;;  %p1468_p6 = por %p169_p4, %p168_p3 }
   0xa   : > { %p1112_p7 = scmp.ge.s32.totalorder %s1377_s24, 1  ;;  %p205_p8 = scmp.lt.s32.totalorder %s1377_s24, 3 }
   0xc   : > { %p206_p9 = pnand %p1112_p7, %p205_p8 }
   0xd   : > { %v231_v0 = vld [vmem:[%s1764_s2 + $0x10] sm:$0xff] (!%p206_p9)  ;;  %v232_v1 = vld [vmem:[%s1764_s2 + $0x18] sm:$0xff] (!%p206_p9)  ;;  %vm236_vm0 = vcmask (!%p206_p9), 261120   ;;  %v1379_v2 = vmov (!%p206_p9), 0.0|0.0   ;;  %s1114_s13 = sshll.u32 (!%p206_p9), %s1447_s25, 3  ;;  %vm1380_vm2 = vmmov (!%p206_p9), 0   ;;  %v401_v22 = vlaneseq (!%p206_p9) }
   0xe   : > { %209 = sbr.rel (%p206_p9) target bundleno = 1481 (0x5c9), region = 44  ;;  %1179 = vmatprep.subr.bf16.mxu1 (!%p206_p9), %v1379_v2  ;;  %1175 = vmatprep.subr.bf16.mxu0 (!%p206_p9), %v1379_v2  ;;  %vm1177_vm1 = vmpackc.low (!%p206_p9), %vm236_vm0, %vm236_vm0  ;;  %v320_v3 = vmul.f32 (!%p206_p9), %v231_v0, %v231_v0  ;;  %v321_v4 = vmul.f32 (!%p206_p9), %v232_v1, %v232_v1  ;;  %v1482_v5 = vpack.c.bf16 (!%p206_p9), %v232_v1, %v231_v0  ;;  %v1381_v6 = vmov (!%p206_p9), 0.0   ;;  %s1083_s16 = scalar_lea.vmem (!%p206_p9), %s1764_s2, %s1114_s13  ;;  %v1494_v10 = vld [vmem:[%s1767_s5] sm:$0x1] (!%p206_p9) }
   0xf   : > { %1158 = vmatprep.mubr.msk.f32.mxu1 (!%p206_p9), %vm1380_vm2, %v1381_v6  ;;  %1151 = vmatprep.mubr.msk.f32.mxu0 (!%p206_p9), %vm1380_vm2, %v1381_v6  ;;  %v1116_v8 = vld [vmem:[%s1083_s16 + $0x10] sm:$0xff] (!%p206_p9)  ;;  %vm420_vm3 = vcmask (!%p206_p9), 122880   ;;  %v1382_v13 = vmov (!%p206_p9), 1.0   ;;  %v402_v23 = vshrl.u32 (!%p206_p9), %v401_v22, 7  ;;  %vm440_vm6 = vcmask (!%p206_p9), 130048   ;;  %s417_s26 = scalar_lea.vmem (!%p206_p9), %s1766_s4, %s1114_s13  ;;  %s227_s29 = sand.u32 (!%p206_p9), 1, %s1369_s22  }
  0x10   : > { %v1180_v7 = vpack.c.bf16 (!%p206_p9), %v321_v4, %v320_v3  ;;  %1178 = vmatpush3.bf16.xpose.msk.msra.mxu0 (!%p206_p9), %vm1177_vm1, %v1482_v5  ;;  %v316_v9 = vmul.f32 (!%p206_p9), %v1116_v8, %v1116_v8  ;;  %v421_v12 = vsel (!%p206_p9), %vm420_vm3, %v1494_v10, 0.0  ;;  %v418_v43 = vld [vmem:[%s417_s26] sm:$0xff] (!%p206_p9)  ;;  %vm466_vm7 = vcmask (!%p206_p9), 7168   ;;  %s1113_s9 = sshll.u32 (!%p206_p9), %s227_s29, 3  ;;  %p1123_p10 = scmp.ne.s32.totalorder (!%p206_p9), %s1447_s25, 0 }
  0x11   : > { %v1501_v24 = vsub.s32 (!%p206_p9), 0, %v402_v23  ;;  %v419_v44 = vcvt.s32.f32 (!%p206_p9), %v418_v43  ;;  %s1523_s11 = scalar_lea.vmem (!%p206_p9), [#allocation2], %s1113_s9 }
  0x12   : > { %1182 = vmatpush3.bf16.xpose.msk.msra.mxu1 (!%p206_p9), %vm1177_vm1, %v1180_v7  ;;  %v317_v11 = vsel (!%p206_p9), %vm236_vm0, %v316_v9, 0.0 }
  0x13   : > { %318 = vadd.xlane.f32.xlu0 (!%p206_p9), %v317_v11  ;;  %v437_v35 = vrot.slane (!%p206_p9), %v1494_v10, %v1501_v24  ;;  %v449_v47 = vsub.f32 (!%p206_p9), 1.0, %v419_v44 }
  0x15   : > { %s1383_s16 = smov (!%p1123_p10), 127   ;;  %vm1386_vm8 = vmmov (!%p1123_p10), 0   ;;  %v1388_v23 = vmov (!%p1123_p10), 1.0   ;;  %s1389_s26 = smov (!%p1123_p10), 1   ;;  %vm496_vm10 = vcmask (!%p1123_p10), 27648   ;;  %vm861_vm11 = vcmask (!%p1123_p10), 253952  }
  0x16   : > { %vm502_vm12 = vcmask (!%p1123_p10), 3072  }
  0x17   : > { %1152 = vmatmul.mubr.msk.f32.vlgmr.msra.gmra.mrb[0].mxu0 %vm236_vm0, %v1116_v8  ;;  %422 = vadd.xlane.f32.xlu0 %v421_v12 }
  0x19   : > { %1159 = vmatmul.mubr.msk.f32.vlgmr.msra.gmra.mrb[0].mxu1 %vm236_vm0, %v1382_v13 }
  0xa0   : > { %v319_v14 = vpop.xlane.xlu0 %318 }
  0xa4   : > { %v423_v15 = vpop.xlane.xlu0 %422 }
  0xa5   : > { %v424_v16 = vrot.slane %v423_v15, 4 }
  0xa7   : > { %v425_v17 = vadd.f32 %v424_v16, %v423_v15  ;;  %v1530_v16 = vld [vmem:[%s1765_s3 + $0x10] sm:$0xff] (!%p1123_p10) }
  0xa9   : > { %v426_v18 = vrot.slane %v425_v17, 2 }
  0xab   : > { %v427_v19 = vadd.f32 %v426_v18, %v425_v17  ;;  %v488_v17 = vld [vmem:[%s1763_s1] sm:$0xf] (!%p1123_p10)  ;;  %v1384_v18 = vmov (!%p1123_p10), 0  }
  0xac   : > { %1263 = vset.pattern.permute.xlu1 (!%p1123_p10), %v1384_v18  ;;  %1264 = vset.pattern.permute.xlu0 (!%p1123_p10), %v1384_v18 }
  0xad   : > { %v428_v20 = vrot.slane %v427_v19, 1 }
  0xaf   : > { %v429_v21 = vadd.f32 %v428_v20, %v427_v19  ;;  %v1540_v19 = vld [vmem:[%s1765_s3 + $0x18] sm:$0xff] (!%p1123_p10)  ;;  %v1385_v20 = vmov (!%p1123_p10), 0.0|0.0  }
  0xb0   : > { %1183 = vmatprep.subr.bf16.mxu0 (!%p1123_p10), %v1385_v20  ;;  %1186 = vmatprep.subr.bf16.mxu1 (!%p1123_p10), %v1385_v20 }
  0xb1   : > { %1189 = vpush %v429_v21  ;;  %1185 = vmatpush3.bf16.msra.mxu0 (!%p1123_p10), %v1482_v5  ;;  %1188 = vmatpush3.bf16.msra.mxu1 (!%p1123_p10), %v1482_v5  ;;  %v1387_v21 = vmov (!%p1123_p10), 0.0   ;;  %v1554_v5 = vld [vmem:[%s1766_s4] sm:$0xff] (!%p1123_p10) }
  0xb2   : > { %1165 = vmatprep.mubr.msk.f32.mxu0 (!%p1123_p10), %vm1386_vm8, %v1387_v21  ;;  %1172 = vmatprep.mubr.msk.f32.mxu1 (!%p1123_p10), %vm1386_vm8, %v1387_v21 }
  0xe2   : > { %s1190_s28 = spop %1189 }
  0xe3   : > { %v1513_v45 = vstv %s1190_s28 }
  0xe4   : > { %v432_v46 = vsub.f32 16.0, %v1513_v45  ;;  %v455_v48 = vmul.f32 %v1513_v45, %v419_v44 }
  0xe6   : > { %v456_v49 = vmul.f32 %v449_v47, %v432_v46 }
  0xe8   : > { %v457_v50 = vadd.f32 %v456_v49, %v455_v48 }
  0xea   : > { %v312_v25 = vpop.f32.mrb[0].mxu0  ;;  %v458_v51 = vsub.f32 16.0, %v457_v50 }
  0xeb   : > { %v1153_v26 = vpop.f32.mrb[1].mxu0  ;;  %v406_v29 = vmul.f32 2.0, %v312_v25  ;;  %1166 = vmatmul.mubr.msk.f32.vlgmr.msra.gmra.mrb[0].mxu0 (!%p1123_p10), %vm440_vm6, %v1494_v10 }
  0xec   : > { %v397_v27 = vpop.f32.mrb[0].mxu1 }
  0xed   : > { %v404_v28 = vrot.slane %v397_v27, %v1501_v24  ;;  %v1160_v30 = vpop.f32.mrb[1].mxu1  ;;  %1173 = vmatmul.mubr.msk.f32.vlgmr.msra.gmra.mrb[0].mxu1 (!%p1123_p10), %vm440_vm6, %v1388_v23  ;;  %v519_v27 = vcvt.s32.f32 (!%p1123_p10), %v1554_v5 }
  0xef   : > { %v405_v31 = vadd.f32 %v404_v28, %v319_v14  ;;  %v1565_v28 = vld [vmem:[%s1766_s4 + $0x8] sm:$0xff] (!%p1123_p10) }
  0xf0   : > { %v520_v30 = vcvt.s32.f32 (!%p1123_p10), %v1565_v28 }
  0xf1   : > { %v407_v32 = vsub.f32 %v405_v31, %v406_v29  ;;  %v1582_v31 = vld [vmem:[%s1765_s3] sm:$0xff] (!%p1123_p10) }
  0xf3   : > { %v408_v33 = vmax.f32 %v407_v32, 1e-10  ;;  %v1589_v32 = vld [vmem:[%s1765_s3 + $0x8] sm:$0xff] (!%p1123_p10) }
  0xf5   : > { %1257 = vrsqrt.f32 %v408_v33  ;;  %vm411_vm4 = vcmp.eq.f32.partialorder %v408_v33, inf  ;;  %v414_v37 = vand.u32 2147483648, %v408_v33  ;;  %vm413_vm5 = vcmp.eq.f32.partialorder %v408_v33, 0.0 }
  0xf6   : > { %1259 = vrcp.f32 %v457_v50 }
  0xf7   : > { %1261 = vrcp.f32 %v458_v51 }
  0xf8   : > { %1265 = vrcp.f32 (!%p1123_p10), %v432_v46 }
  0xf9   : > { %1267 = vrcp.f32 (!%p1123_p10), %v1513_v45 }
  0xff   : > { %v1258_v34 = vpop.eup %1257 }
 0x100   : > { %v410_v36 = vmul.f32 %v1258_v34, %v408_v33  ;;  %v1260_v59 = vpop.eup %1259 }
 0x101   : > { %v1262_v62 = vpop.eup %1261 }
 0x102   : > { %v412_v38 = vsel %vm411_vm4, %v408_v33, %v410_v36  ;;  %v487_v33 = vand.u32 (!%p1123_p10), 127, %v401_v22  ;;  %v485_v36 = vld [vmem:[%s1762_s0] sm:$0xf] (!%p1123_p10) }
 0x103   : > { %v415_v39 = vsel %vm413_vm5, %v414_v37, %v412_v38 }
 0x104   : > { %v439_v40 = vmul.f32 %v437_v35, %v415_v39  ;;  %v444_v42 = vsel %vm440_vm6, %v415_v39, 0.0 }
 0x106   : > { %v441_v41 = vsel %vm440_vm6, %v439_v40, 0.0  ;;  %v1266_v40 = vpop.eup (!%p1123_p10), %1265 }
 0x107   : > { %442 = vadd.xlane.f32.xlu1 %v441_v41 }
 0x10b   : > { %445 = vadd.xlane.f32.xlu1 %v444_v42 }
 0x11c   : > { %490 = vperm.xlu1 (!%p1123_p10), %1263, %v488_v17  }
 0x194   : > { %v443_v52 = vpop.xlane.xlu1 %442 }
 0x195   : > { %v448_v55 = vmul.f32 %v443_v52, %v419_v44  ;;  %v453_v56 = vmul.f32 %v449_v47, %v443_v52 }
 0x198   : > { %v446_v53 = vpop.xlane.xlu1 %445 }
 0x199   : > { %v447_v54 = vsub.f32 %v446_v53, %v443_v52 }
 0x19b   : > { %v450_v57 = vmul.f32 %v449_v47, %v447_v54  ;;  %v452_v58 = vmul.f32 %v447_v54, %v419_v44  ;;  %v1268_v44 = vpop.eup (!%p1123_p10), %1267 }
 0x19c   : > { %v491_v34 = vpop.permute.xlu1 (!%p1123_p10), %490 }
 0x19d   : > { %v451_v60 = vadd.f32 %v450_v57, %v448_v55  ;;  %v454_v61 = vadd.f32 %v453_v56, %v452_v58  ;;  %vm492_vm9 = vcmp.eq.s32.totalorder (!%p1123_p10), %v487_v33, %v491_v34  ;;  %v570_v34 = vsub.f32 (!%p1123_p10), 1.0, %v520_v30 }
 0x19e   : > { %v1124_v35 = vsel (!%p1123_p10), %vm492_vm9, 1.0, %v1387_v21 }
 0x19f   : > { %v460_v63 = vmul.f32 %v1260_v59, %v451_v60  ;;  %v462_v0 = vmul.f32 %v1262_v62, %v454_v61  ;;  %v495_v37 = vmul.f32 (!%p1123_p10), %v1124_v35, %v485_v36 }
 0x1a1   : > { %v463_v1 = vsub.f32 %v460_v63, %v462_v0  ;;  %v497_v38 = vsel (!%p1123_p10), %vm496_vm10, %v495_v37, 0.0 }
 0x1a3   : > { %v464_v2 = vadd.f32 0.5, %v463_v1 }
 0x1a5   : > { %v465_v3 = vmax.f32 %v464_v2, 0.0 }
 0x1a7   : > { %v467_v4 = vsel %vm466_vm7, %v465_v3, 0.0 }
 0x1a8   : > { %468 = vadd.xlane.f32.xlu0 %v467_v4 }
 0x1be   : > { %525 = vrot.lane.b32.xlu0 (!%p1123_p10), %v1530_v16, %s1383_s16  ;;  %v751_v39 = vpop.f32.mrb[0].mxu0 (!%p1123_p10) }
 0x1bf   : > { %v1167_v41 = vpop.f32.mrb[1].mxu0 (!%p1123_p10)  ;;  %v1603_v48 = vmul.f32 (!%p1123_p10), %v1268_v44, %v751_v39 }
 0x1c0   : > { %v823_v22 = vpop.f32.mrb[0].mxu1 (!%p1123_p10) }
 0x1c1   : > { %v827_v42 = vsub.f32 (!%p1123_p10), %v823_v22, %v751_v39  ;;  %v1174_v43 = vpop.f32.mrb[1].mxu1 (!%p1123_p10)  ;;  %v926_v45 = vmul.f32 (!%p1123_p10), %v1603_v48, %v1603_v48  ;;  %v937_v55 = vsel (!%p1123_p10), %vm861_vm11, %v1603_v48, 0.0  ;;  %v572_v39 = vmul.f32 (!%p1123_p10), %v570_v34, %v1540_v19 }
 0x1c2   : > { %527 = vrot.lane.b32.xlu0 (!%p1123_p10), %v1540_v19, %s1383_s16 }
 0x1c3   : > { %v1601_v47 = vmul.f32 (!%p1123_p10), %v1266_v40, %v827_v42  ;;  %v927_v51 = vsel (!%p1123_p10), %vm861_vm11, %v926_v45, 0.0 }
 0x1c5   : > { %v860_v49 = vmul.f32 (!%p1123_p10), %v1601_v47, %v1601_v47  ;;  %v872_v46 = vsel (!%p1123_p10), %vm861_vm11, %v1601_v47, 0.0 }
 0x1c7   : > { %v862_v50 = vsel (!%p1123_p10), %vm861_vm11, %v860_v49, 0.0 }
 0x235   : > { %v469_v6 = vpop.xlane.xlu0 %468 }
 0x236   : > { %v470_v7 = vrot.slane %v469_v6, 4 }
 0x238   : > { %v471_v8 = vadd.f32 %v470_v7, %v469_v6 }
 0x239   : > { %v526_v25 = vpop.permute.xlu0 (!%p1123_p10), %525 }
 0x23a   : > { %v472_v9 = vrot.slane %v471_v8, 2  ;;  %v1557_v26 = vmax.f32 (!%p1123_p10), %v1530_v16, %v526_v25 }
 0x23c   : > { %v473_v11 = vadd.f32 %v472_v9, %v471_v8  ;;  %541 = vrot.lane.b32.xlu1 (!%p1123_p10), %v1557_v26, %s1389_s26 }
 0x23d   : > { %v528_v10 = vpop.permute.xlu0 (!%p1123_p10), %527 }
 0x23e   : > { %v474_v12 = vrot.slane %v473_v11, 1  ;;  %v1568_v29 = vmax.f32 (!%p1123_p10), %v1540_v19, %v528_v10  ;;  %v569_v10 = vsub.f32 (!%p1123_p10), 1.0, %v519_v27 }
 0x240   : > { %v475_v13 = vadd.f32 %v474_v12, %v473_v11  ;;  %543 = vrot.lane.b32.xlu0 (!%p1123_p10), %v1568_v29, %s1389_s26  ;;  %575 = vrot.lane.b32.xlu1 (!%p1123_p10), %v519_v27, %s1389_s26  ;;  %v533_v11 = vsub.f32 (!%p1123_p10), %v1530_v16, %v1557_v26  ;;  %v571_v35 = vmul.f32 (!%p1123_p10), %v569_v10, %v1530_v16 }
 0x242   : > { %1191 = vpush %v475_v13  ;;  %v535_v12 = vmul.f32 (!%p1123_p10), 1.442695, %v533_v11  ;;  %v534_v13 = vsub.f32 (!%p1123_p10), %v1540_v19, %v1568_v29 }
 0x244   : > { %577 = vrot.lane.b32.xlu0 (!%p1123_p10), %v520_v30, %s1389_s26 }
 0x248   : > { %613 = vrot.lane.b32.xlu0 (!%p1123_p10), %v1582_v31, %s1383_s16 }
 0x24c   : > { %615 = vrot.lane.b32.xlu0 (!%p1123_p10), %v1589_v32, %s1383_s16 }
 0x264   : > { %498 = vadd.xlane.f32.xlu1 (!%p1123_p10), %v497_v38 }
 0x268   : > { %863 = vadd.xlane.f32.xlu1 (!%p1123_p10), %v862_v50 }
 0x26c   : > { %873 = vadd.xlane.f32.xlu1 (!%p1123_p10), %v872_v46 }
 0x270   : > { %928 = vadd.xlane.f32.xlu1 (!%p1123_p10), %v927_v51 }
 0x271   : > { %484 = sbr.rel (%p1123_p10) target bundleno = 1457 (0x5b1), region = 48 }
 0x273   : > { %s1192_s10 = spop %1191 }
 0x274   : > { %v477_v14 = vstv %s1192_s10  ;;  %938 = vadd.xlane.f32.xlu1 (!%p1123_p10), %v937_v55 }
 0x275   : > { %v479_v15 = vmul.f32 0.0625, %v477_v14  ;;  %v537_v14 = vmul.f32 (!%p1123_p10), 1.442695, %v534_v13 }
 0x277   : > { %480 = vst [vmem:[%s1523_s11] sm:$0xff] %v479_v15 }
 0x2ae   : > { %v542_v52 = vpop.permute.xlu1 %541 }
 0x2af   : > { %v547_v53 = vsub.f32 %v1530_v16, %v542_v52  ;;  %v833_v52 = vld [vmem:[%s1764_s2 + $0x8] sm:$0xff] }
 0x2b1   : > { %v549_v54 = vmul.f32 1.442695, %v547_v53  ;;  %v835_v53 = vmul.f32 %v833_v52, %v833_v52 }
 0x2b2   : > { %v544_v56 = vpop.permute.xlu0 %543  ;;  %v576_v60 = vpop.permute.xlu1 %575 }
 0x2b3   : > { %1269 = vpow2.f32 %v549_v54  ;;  %v548_v57 = vsub.f32 %v1540_v19, %v544_v56  ;;  %v581_v63 = vmul.f32 %v576_v60, %v1530_v16  ;;  %v851_v54 = vrot.slane %v1601_v47, %v1501_v24  ;;  %v832_v60 = vld [vmem:[%s1764_s2] sm:$0xff] }
 0x2b4   : > { %v839_v55 = vsel %vm236_vm0, %v835_v53, 0.0 }
 0x2b5   : > { %v551_v58 = vmul.f32 1.442695, %v548_v57  ;;  %v853_v56 = vmul.f32 %v851_v54, %v833_v52  ;;  %v917_v57 = vrot.slane %v1603_v48, %v1501_v24  ;;  %v845_v24 = vsel %vm236_vm0, %v833_v52, 0.0 }
 0x2b6   : > { %v578_v61 = vpop.permute.xlu0 %577  ;;  %v852_v48 = vmul.f32 %v851_v54, %v832_v60 }
 0x2b7   : > { %1271 = vpow2.f32 %v551_v58  ;;  %v582_v1 = vmul.f32 %v578_v61, %v1540_v19  ;;  %v857_v58 = vsel %vm236_vm0, %v853_v56, 0.0  ;;  %v834_v61 = vmul.f32 %v832_v60, %v832_v60 }
 0x2b9   : > { %v836_v47 = vsel %vm236_vm0, %v834_v61, 0.0 }
 0x2ba   : > { %v1616_v0 = vpop.permute.xlu0 %613 }
 0x2bb   : > { %v1623_v2 = vmax.f32 %v1582_v31, %v1616_v0  ;;  %vm665_vm8 = vcmp.ge.f32.partialorder %v1582_v31, %v1616_v0 }
 0x2bd   : > { %v1270_v59 = vpop.eup %1269  ;;  %v621_v34 = vsub.f32 %v1582_v31, %v1623_v2 }
 0x2be   : > { %555 = vrot.lane.b32.xlu0 %v1270_v59, %s1383_s16  ;;  %v1625_v3 = vpop.permute.xlu0 %615  ;;  %v919_v59 = vmul.f32 %v917_v57, %v833_v52 }
 0x2bf   : > { %v1631_v4 = vmax.f32 %v1589_v32, %v1625_v3  ;;  %vm666_vm9 = vcmp.ge.f32.partialorder %v1589_v32, %v1625_v3 }
 0x2c1   : > { %v1272_v62 = vpop.eup %1271 }
 0x2c2   : > { %557 = vrot.lane.b32.xlu0 %v1272_v62, %s1383_s16  ;;  %v923_v62 = vsel %vm236_vm0, %v919_v59, 0.0 }
 0x2c6   : > { %585 = vrot.lane.b32.xlu0 %v581_v63, %s1383_s16  ;;  %v842_v63 = vsel %vm236_vm0, %v832_v60, 0.0 }
 0x2ca   : > { %587 = vrot.lane.b32.xlu0 %v582_v1, %s1383_s16  ;;  %v854_v1 = vsel %vm236_vm0, %v852_v48, 0.0 }
 0x2ce   : > { %629 = vrot.lane.b32.xlu0 %v1623_v2, %s1389_s26 }
 0x2d2   : > { %631 = vrot.lane.b32.xlu0 %v1631_v4, %s1389_s26 }
 0x2f1   : > { %v499_v6 = vpop.xlane.xlu1 %498 }
 0x2f2   : > { %1273 = vlog2.f32 %v499_v6  ;;  %v918_v6 = vmul.f32 %v917_v57, %v832_v60 }
 0x2f3   : > { %1275 = vpow2.f32 %v535_v12 }
 0x2f4   : > { %1277 = vpow2.f32 %v537_v14 }
 0x2fc   : > { %v1274_v7 = vpop.eup %1273 }
 0x2fd   : > { %v501_v8 = vmul.f32 0.6931472, %v1274_v7  ;;  %v1276_v15 = vpop.eup %1275 }
 0x2fe   : > { %v1278_v20 = vpop.eup %1277 }
 0x2ff   : > { %v503_v9 = vsel %vm502_vm12, %v501_v8, 0.0 }
 0x300   : > { %504 = vadd.xlane.f32.xlu0 %v503_v9  ;;  %v920_v9 = vsel %vm236_vm0, %v918_v6, 0.0 }
 0x330   : > { %v556_v17 = vpop.permute.xlu0 %555 }
 0x331   : > { %v561_v18 = vadd.f32 %v1276_v15, %v556_v17  ;;  %v622_v17 = vsub.f32 %v1589_v32, %v1631_v4 }
 0x333   : > { %1279 = vlog2.f32 %v561_v18  ;;  %v625_v18 = vmul.f32 1.442695, %v622_v17 }
 0x334   : > { %v558_v23 = vpop.permute.xlu0 %557 }
 0x335   : > { %v562_v25 = vadd.f32 %v1278_v20, %v558_v23  ;;  %v864_v20 = vpop.xlane.xlu1 %863 }
 0x337   : > { %1281 = vlog2.f32 %v562_v25 }
 0x338   : > { %v586_v33 = vpop.permute.xlu0 %585 }
 0x339   : > { %v591_v22 = vadd.f32 %v586_v33, %v571_v35  ;;  %v874_v23 = vpop.xlane.xlu1 %873 }
 0x33c   : > { %v588_v36 = vpop.permute.xlu0 %587 }
 0x33d   : > { %v1280_v37 = vpop.eup %1279  ;;  %v592_v44 = vadd.f32 %v588_v36, %v572_v39  ;;  %v929_v35 = vpop.xlane.xlu1 %928  ;;  %v623_v36 = vmul.f32 1.442695, %v621_v34  ;;  %v875_v39 = vrot.slane %v874_v23, 4 }
 0x33e   : > { %v564_v38 = vmul.f32 0.6931472, %v1280_v37  ;;  %v865_v37 = vrot.slane %v864_v20, 4 }
 0x340   : > { %v567_v40 = vadd.f32 %v564_v38, %v1557_v26  ;;  %v630_v41 = vpop.permute.xlu0 %629 }
 0x341   : > { %v1282_v42 = vpop.eup %1281  ;;  %v635_v16 = vsub.f32 %v1582_v31, %v630_v41  ;;  %v939_v38 = vpop.xlane.xlu1 %938  ;;  %v866_v41 = vadd.f32 %v865_v37, %v864_v20 }
 0x342   : > { %v566_v43 = vmul.f32 0.6931472, %v1282_v42  ;;  %v593_v5 = vsub.f32 %v567_v40, %v591_v22  ;;  %v930_v40 = vrot.slane %v929_v35, 4  ;;  %v940_v4 = vrot.slane %v939_v38, 4 }
 0x343   : > { %v637_v45 = vmul.f32 1.442695, %v635_v16 }
 0x344   : > { %v568_v27 = vadd.f32 %v566_v43, %v1568_v29  ;;  %v632_v49 = vpop.permute.xlu0 %631  ;;  %v595_v46 = vsel %vm466_vm7, %v593_v5, 0.0  ;;  %v876_v43 = vadd.f32 %v875_v39, %v874_v23  ;;  %v941_v5 = vadd.f32 %v940_v4, %v939_v38 }
 0x345   : > { %v636_v28 = vsub.f32 %v1589_v32, %v632_v49 }
 0x346   : > { %v594_v30 = vsub.f32 %v568_v27, %v592_v44  ;;  %v931_v44 = vadd.f32 %v930_v40, %v929_v35  ;;  %v867_v27 = vrot.slane %v866_v41, 2  ;;  %v942_v16 = vrot.slane %v941_v5, 2 }
 0x347   : > { %v639_v50 = vmul.f32 1.442695, %v636_v28  ;;  %v877_v28 = vrot.slane %v876_v43, 2 }
 0x348   : > { %v596_v19 = vsel %vm466_vm7, %v594_v30, 0.0  ;;  %v932_v2 = vrot.slane %v931_v44, 2  ;;  %v943_v56 = vadd.f32 %v942_v16, %v941_v5 }
 0x349   : > { %1283 = vpow2.f32 %v639_v50  ;;  %v597_v26 = vadd.f32 %v596_v19, %v595_v46  ;;  %v878_v53 = vadd.f32 %v877_v28, %v876_v43 }
 0x34a   : > { %1285 = vpow2.f32 %v637_v45  ;;  %v933_v54 = vadd.f32 %v932_v2, %v931_v44 }
 0x34b   : > { %598 = vadd.xlane.f32.xlu1 %v597_v26  ;;  %1287 = vpow2.f32 %v625_v18  ;;  %v868_v26 = vadd.f32 %v867_v27, %v866_v41  ;;  %v879_v59 = vrot.slane %v878_v53, 1 }
 0x34c   : > { %v934_v60 = vrot.slane %v933_v54, 1 }
 0x34d   : > { %v869_v57 = vrot.slane %v868_v26, 1 }
 0x353   : > { %v1651_v51 = vpop.eup %1283 }
 0x354   : > { %645 = vrot.lane.b32.xlu0 %v1651_v51, %s1383_s16  ;;  %v1655_v29 = vpop.eup %1285 }
 0x355   : > { %v1288_v25 = vpop.eup %1287 }
 0x35c   : > { %643 = vrot.lane.b32.xlu1 %v1655_v29, %s1383_s16 }
 0x373   : > { %840 = vadd.xlane.f32.xlu0 %v839_v55 }
 0x377   : > { %858 = vadd.xlane.f32.xlu0 %v857_v58 }
 0x37b   : > { %924 = vadd.xlane.f32.xlu0 %v923_v62  ;;  %v944_v62 = vrot.slane %v943_v56, 1 }
 0x37d   : > { %v945_v48 = vadd.f32 %v944_v62, %v943_v56 }
 0x380   : > { %837 = vadd.xlane.f32.xlu1 %v836_v47  ;;  %v870_v47 = vadd.f32 %v869_v57, %v868_v26 }
 0x384   : > { %843 = vadd.xlane.f32.xlu1 %v842_v63  ;;  %v880_v63 = vadd.f32 %v879_v59, %v878_v53 }
 0x388   : > { %846 = vadd.xlane.f32.xlu1 %v845_v24  ;;  %v935_v24 = vadd.f32 %v934_v60, %v933_v54 }
 0x38c   : > { %855 = vadd.xlane.f32.xlu1 %v854_v1 }
 0x38d   : > { %v505_v7 = vpop.xlane.xlu0 %504 }
 0x38e   : > { %v506_v8 = vrot.slane %v505_v7, 4 }
 0x390   : > { %921 = vadd.xlane.f32.xlu1 %v920_v9  ;;  %v507_v11 = vadd.f32 %v506_v8, %v505_v7 }
 0x391   : > { %673 = vrot.lane.b32.xlu0 %v1589_v32, %s1389_s26 }
 0x392   : > { %v508_v12 = vrot.slane %v507_v11, 2 }
 0x394   : > { %v509_v13 = vadd.f32 %v508_v12, %v507_v11 }
 0x396   : > { %v510_v14 = vrot.slane %v509_v13, 1 }
 0x398   : > { %v511_v15 = vadd.f32 %v510_v14, %v509_v13 }
 0x39a   : > { %1193 = vpush %v511_v15 }
 0x3a1   : > { %671 = vrot.lane.b32.xlu1 %v1582_v31, %s1389_s26 }
 0x3c6   : > { %v646_v10 = vpop.permute.xlu0 %645 }
 0x3c7   : > { %v650_v33 = vadd.f32 %v1288_v25, %v646_v10 }
 0x3c9   : > { %1289 = vrcp.f32 %v650_v33 }
 0x3ca   : > { %1291 = vpow2.f32 %v623_v36 }
 0x3cb   : > { %s1691_s9 = spop %1193 }
 0x3d3   : > { %v1290_v22 = vpop.eup %1289 }
 0x3d4   : > { %v1685_v42 = vmul.f32 %v1290_v22, %v1288_v25  ;;  %v1292_v46 = vpop.eup %1291 }
 0x3d8   : > { %v599_v49 = vpop.xlane.xlu1 %598 }
 0x3d9   : > { %v600_v30 = vrot.slane %v599_v49, 4 }
 0x3db   : > { %v601_v50 = vadd.f32 %v600_v30, %v599_v49 }
 0x3dc   : > { %v644_v19 = vpop.permute.xlu1 %643 }
 0x3dd   : > { %v602_v45 = vrot.slane %v601_v50, 2  ;;  %v649_v52 = vadd.f32 %v1292_v46, %v644_v19 }
 0x3df   : > { %1293 = vrcp.f32 %v649_v52  ;;  %v603_v55 = vadd.f32 %v602_v45, %v601_v50 }
 0x3e1   : > { %v604_v58 = vrot.slane %v603_v55, 1 }
 0x3e3   : > { %v605_v61 = vadd.f32 %v604_v58, %v603_v55 }
 0x3e5   : > { %1195 = vpush %v605_v61 }
 0x3e6   : > { %1197 = vpush %v870_v47 }
 0x3e7   : > { %1199 = vpush %v880_v63 }
 0x3e8   : > { %1201 = vpush %v935_v24 }
 0x3e9   : > { %v1294_v1 = vpop.eup %1293  ;;  %1203 = vpush %v945_v48 }
 0x3ea   : > { %657 = vrot.lane.b32.xlu1 %v1294_v1, %s1389_s26  ;;  %v1688_v6 = vmul.f32 %v1294_v1, %v1292_v46 }
 0x3ee   : > { %659 = vrot.lane.b32.xlu1 %v1290_v22, %s1389_s26 }
 0x400   : > { %v841_v7 = vpop.xlane.xlu0 %840 }
 0x404   : > { %v859_v11 = vpop.xlane.xlu0 %858 }
 0x405   : > { %v888_v23 = vmul.f32 2.0, %v859_v11 }
 0x408   : > { %v925_v14 = vpop.xlane.xlu0 %924 }
 0x409   : > { %v953_v38 = vmul.f32 2.0, %v925_v14 }
 0x40d   : > { %v838_v8 = vpop.xlane.xlu1 %837 }
 0x411   : > { %v844_v9 = vpop.xlane.xlu1 %843 }
 0x415   : > { %v847_v12 = vpop.xlane.xlu1 %846 }
 0x416   : > { %s1693_s10 = spop %1195 }
 0x417   : > { %s1198_s12 = spop %1197 }
 0x418   : > { %v882_v13 = vstv %s1198_s12  ;;  %s1200_s13 = spop %1199 }
 0x419   : > { %v883_v15 = vadd.f32 %v882_v13, %v838_v8  ;;  %v884_v17 = vadd.f32 %v882_v13, %v841_v7  ;;  %v891_v18 = vstv %s1200_s13  ;;  %s1202_s14 = spop %1201  ;;  %v856_v20 = vpop.xlane.xlu1 %855 }
 0x41a   : > { %v892_v25 = vsub.f32 %v844_v9, %v891_v18  ;;  %v893_v10 = vsub.f32 %v847_v12, %v891_v18  ;;  %v947_v33 = vstv %s1202_s14  ;;  %s1204_s26 = spop %1203  ;;  %v887_v22 = vmul.f32 2.0, %v856_v20 }
 0x41b   : > { %v885_v34 = vadd.f32 3.2e-11, %v883_v15  ;;  %v886_v35 = vadd.f32 3.2e-11, %v884_v17  ;;  %v948_v36 = vadd.f32 %v947_v33, %v838_v8  ;;  %v949_v37 = vadd.f32 %v947_v33, %v841_v7 }
 0x41c   : > { %v894_v39 = vmul.f32 2e-06, %v892_v25  ;;  %v956_v40 = vstv %s1204_s26  ;;  %v895_v41 = vmul.f32 2e-06, %v893_v10 }
 0x41d   : > { %v890_v4 = vsub.f32 %v886_v35, %v888_v23  ;;  %v951_v43 = vadd.f32 3.2e-11, %v949_v37  ;;  %v957_v44 = vsub.f32 %v844_v9, %v956_v40  ;;  %v922_v5 = vpop.xlane.xlu1 %921  ;;  %v950_v27 = vadd.f32 3.2e-11, %v948_v36 }
 0x41e   : > { %v958_v49 = vsub.f32 %v847_v12, %v956_v40  ;;  %v889_v28 = vsub.f32 %v885_v34, %v887_v22  ;;  %v952_v30 = vmul.f32 2.0, %v922_v5 }
 0x41f   : > { %v897_v2 = vadd.f32 %v895_v41, %v890_v4  ;;  %v955_v16 = vsub.f32 %v951_v43, %v953_v38  ;;  %v959_v50 = vmul.f32 2e-06, %v957_v44  ;;  %v674_v38 = vpop.permute.xlu0 %673 }
 0x420   : > { %v960_v46 = vmul.f32 2e-06, %v958_v49  ;;  %v896_v19 = vadd.f32 %v894_v39, %v889_v28  ;;  %v954_v26 = vsub.f32 %v950_v27, %v952_v30  ;;  %vm678_vm5 = vcmp.ge.f32.partialorder %v1589_v32, %v674_v38 }
 0x421   : > { %v899_v45 = vmax.f32 %v897_v2, 0.0  ;;  %v672_v39 = vpop.permute.xlu1 %671  ;;  %v1128_v40 = vsel %vm678_vm5, 1.0, %v1387_v21  ;;  %v1125_v49 = vsel %vm665_vm8, 1.0, %v1387_v21 }
 0x422   : > { %v962_v52 = vadd.f32 %v960_v46, %v955_v16  ;;  %v898_v53 = vmax.f32 %v896_v19, 0.0  ;;  %v961_v54 = vadd.f32 %v959_v50, %v954_v26  ;;  %vm677_vm6 = vcmp.ge.f32.partialorder %v1582_v31, %v672_v39 }
 0x423   : > { %1295 = vrsqrt.f32 %v899_v45  ;;  %vm909_vm13 = vcmp.eq.f32.partialorder %v899_v45, inf  ;;  %vm911_vm14 = vcmp.eq.f32.partialorder %v899_v45, 0.0  ;;  %v912_v47 = vand.u32 2147483648, %v899_v45 }
 0x424   : > { %v964_v55 = vmax.f32 %v962_v52, 0.0  ;;  %1297 = vrsqrt.f32 %v898_v53  ;;  %v963_v56 = vmax.f32 %v961_v54, 0.0  ;;  %vm902_vm0 = vcmp.eq.f32.partialorder %v898_v53, inf }
 0x425   : > { %v905_v48 = vand.u32 2147483648, %v898_v53  ;;  %vm904_vm3 = vcmp.eq.f32.partialorder %v898_v53, 0.0  ;;  %v1127_v22 = vsel %vm677_vm6, 1.0, %v1387_v21  ;;  %v1126_v46 = vsel %vm666_vm9, 1.0, %v1387_v21 }
 0x426   : > { %1299 = vrsqrt.f32 %v964_v55  ;;  %vm974_vm15 = vcmp.eq.f32.partialorder %v964_v55, inf  ;;  %v977_v7 = vand.u32 2147483648, %v964_v55  ;;  %vm976_vm1 = vcmp.eq.f32.partialorder %v964_v55, 0.0 }
 0x427   : > { %1301 = vrsqrt.f32 %v963_v56  ;;  %vm967_vm2 = vcmp.eq.f32.partialorder %v963_v56, inf  ;;  %v970_v12 = vand.u32 2147483648, %v963_v56  ;;  %vm969_vm4 = vcmp.eq.f32.partialorder %v963_v56, 0.0 }
 0x42d   : > { %v1296_v57 = vpop.eup %1295 }
 0x42e   : > { %v1298_v58 = vpop.eup %1297  ;;  %v908_v59 = vmul.f32 %v1296_v57, %v899_v45 }
 0x42f   : > { %v901_v60 = vmul.f32 %v1298_v58, %v898_v53 }
 0x430   : > { %v1300_v61 = vpop.eup %1299  ;;  %v910_v62 = vsel %vm909_vm13, %v899_v45, %v908_v59 }
 0x431   : > { %v1302_v63 = vpop.eup %1301  ;;  %v973_v24 = vmul.f32 %v1300_v61, %v964_v55  ;;  %v913_v1 = vsel %vm911_vm14, %v912_v47, %v910_v62  ;;  %v903_v8 = vsel %vm902_vm0, %v898_v53, %v901_v60 }
 0x432   : > { %v966_v9 = vmul.f32 %v1302_v63, %v963_v56  ;;  %v906_v17 = vsel %vm904_vm3, %v905_v48, %v903_v8  ;;  %v607_v8 = vstv %s1693_s10 }
 0x433   : > { %v975_v11 = vsel %vm974_vm15, %v964_v55, %v973_v24 }
 0x434   : > { %v978_v13 = vsel %vm976_vm1, %v977_v7, %v975_v11  ;;  %v968_v14 = vsel %vm967_vm2, %v963_v56, %v966_v9  ;;  %v513_v7 = vstv %s1691_s9  ;;  %v608_v9 = vmul.f32 0.0625, %v607_v8 }
 0x435   : > { %v980_v15 = vmax.f32 %v913_v1, %v978_v13  ;;  %v971_v18 = vsel %vm969_vm4, %v970_v12, %v968_v14 }
 0x436   : > { %v979_v20 = vmax.f32 %v906_v17, %v971_v18 }
 0x437   : > { %v988_v23 = vsub.f32 %v978_v13, %v980_v15  ;;  %v982_v25 = vsub.f32 %v913_v1, %v980_v15  ;;  %v1041_v15 = vld [vmem:[%s1523_s11] sm:$0xff] }
 0x438   : > { %v987_v10 = vsub.f32 %v971_v18, %v979_v20  ;;  %v981_v33 = vsub.f32 %v906_v17, %v979_v20 }
 0x439   : > { %v991_v34 = vmul.f32 1.442695, %v988_v23  ;;  %v985_v35 = vmul.f32 1.442695, %v982_v25 }
 0x43a   : > { %v989_v36 = vmul.f32 1.442695, %v987_v10  ;;  %v983_v37 = vmul.f32 1.442695, %v981_v33 }
 0x43b   : > { %1303 = vpow2.f32 %v991_v34 }
 0x43c   : > { %1305 = vpow2.f32 %v989_v36 }
 0x43d   : > { %1307 = vpow2.f32 %v985_v35 }
 0x43e   : > { %1309 = vpow2.f32 %v983_v37 }
 0x445   : > { %v1304_v4 = vpop.eup %1303 }
 0x446   : > { %v1306_v41 = vpop.eup %1305  ;;  %v1000_v43 = vmul.f32 %v1304_v4, %v1128_v40 }
 0x447   : > { %v1308_v44 = vpop.eup %1307  ;;  %v999_v5 = vmul.f32 %v1306_v41, %v1127_v22 }
 0x448   : > { %v1310_v27 = vpop.eup %1309  ;;  %1005 = vrot.lane.b32.xlu1 %v1000_v43, %s1383_s16  ;;  %v994_v28 = vadd.f32 %v1308_v44, %v1304_v4  ;;  %v998_v19 = vmul.f32 %v1308_v44, %v1126_v46 }
 0x449   : > { %1003 = vrot.lane.b32.xlu0 %v999_v5, %s1383_s16  ;;  %v993_v30 = vadd.f32 %v1310_v27, %v1306_v41  ;;  %v997_v2 = vmul.f32 %v1310_v27, %v1125_v49 }
 0x44a   : > { %1311 = vrcp.f32 %v994_v28 }
 0x44b   : > { %1313 = vrcp.f32 %v993_v30 }
 0x454   : > { %v1312_v53 = vpop.eup %1311 }
 0x455   : > { %v1314_v54 = vpop.eup %1313 }
 0x45c   : > { %v658_v16 = vpop.permute.xlu1 %657 }
 0x45d   : > { %v663_v50 = vmul.f32 %v1655_v29, %v658_v16 }
 0x45f   : > { %1015 = vrot.lane.b32.xlu0 %v663_v50, %s1383_s16 }
 0x460   : > { %v660_v31 = vpop.permute.xlu1 %659 }
 0x461   : > { %v664_v0 = vmul.f32 %v1651_v51, %v660_v31 }
 0x463   : > { %1017 = vrot.lane.b32.xlu1 %v664_v0, %s1383_s16 }
 0x4ba   : > { %v1006_v26 = vpop.permute.xlu1 %1005 }
 0x4bb   : > { %v1010_v45 = vadd.f32 %v1006_v26, %v998_v19  ;;  %v1004_v52 = vpop.permute.xlu0 %1003 }
 0x4bc   : > { %v1009_v29 = vadd.f32 %v1004_v52, %v997_v2 }
 0x4bd   : > { %v1012_v55 = vmul.f32 %v1312_v53, %v1010_v45 }
 0x4be   : > { %v1011_v56 = vmul.f32 %v1314_v54, %v1009_v29 }
 0x4d1   : > { %v1016_v57 = vpop.permute.xlu0 %1015 }
 0x4d2   : > { %v1021_v51 = vmul.f32 %v1016_v57, %v1688_v6 }
 0x4d4   : > { %v1023_v58 = vmul.f32 %v1021_v51, %v1011_v56 }
 0x4d5   : > { %v1018_v59 = vpop.permute.xlu1 %1017 }
 0x4d6   : > { %v1022_v32 = vmul.f32 %v1018_v59, %v1685_v42  ;;  %v1025_v21 = vsel %vm466_vm7, %v1023_v58, 0.0  ;;  %v514_v42 = vsub.f32 0.0, %v513_v7 }
 0x4d8   : > { %v1024_v3 = vmul.f32 %v1022_v32, %v1012_v55  ;;  %v516_v11 = vmul.f32 0.25, %v514_v42 }
 0x4da   : > { %v1026_v60 = vsel %vm466_vm7, %v1024_v3, 0.0  ;;  %v1039_v13 = vadd.f32 %v608_v9, %v516_v11 }
 0x4db   : > { %v1027_v61 = vadd.f32 %v1026_v60, %v1025_v21 }
 0x4dd   : > { %1028 = vadd.xlane.f32.xlu0 %v1027_v61 }
 0x56a   : > { %v1029_v62 = vpop.xlane.xlu0 %1028 }
 0x56b   : > { %v1030_v47 = vrot.slane %v1029_v62, 4 }
 0x56d   : > { %v1031_v63 = vadd.f32 %v1030_v47, %v1029_v62 }
 0x56f   : > { %v1032_v24 = vrot.slane %v1031_v63, 2 }
 0x571   : > { %v1033_v48 = vadd.f32 %v1032_v24, %v1031_v63 }
 0x573   : > { %v1034_v6 = vrot.slane %v1033_v48, 1 }
 0x575   : > { %v1035_v1 = vadd.f32 %v1034_v6, %v1033_v48 }
 0x577   : > { %1205 = vpush %v1035_v1 }
 0x5a8   : > { %s1206_s16 = spop %1205 }
 0x5a9   : > { %v1037_v12 = vstv %s1206_s16 }
 0x5aa   : > { %v1038_v14 = vmul.f32 0.0625, %v1037_v12 }
 0x5ac   : > { %v1040_v17 = vadd.f32 %v1039_v13, %v1038_v14 }
 0x5ae   : > { %v1042_v18 = vadd.f32 %v1041_v15, %v1040_v17 }
 0x5b0   : > { %1043 = vst [vmem:[%s1523_s11] sm:$0xff] %v1042_v18 }
 0x5b1 PF: > { %s1132_s15 = sshll.u32 %s1447_s25, 7  ;;  %s1058_s20 = sshll.u32 %s1523_s11, 4  ;;  %s1059_s20 = int_to_ptr.vmem [resolvable:$true] %s1058_s20 }
 0x5b2   : > { %s1723_s19 = scalar_lea.hbm %s1768_s6, %s1132_s15  ;;  %s1045_s28 = scalar_lea.sflag [#allocation3], %s227_s29 }
 0x5b3   : > { %s1315_s9 = scalar_lea.vmem %s1059_s20, 128  ;;  %s1390_s10 = smov [#allocation2]  }
 0x5b4   : > { %p1316_p11 = scmp.ne.s32.totalorder %s1059_s20, %s1315_s9  ;;  %s1319_s12 = sshll.u32 %s1390_s10, 4  ;;  %s1320_s12 = int_to_ptr.vmem [resolvable:$false] %s1319_s12 }
 0x5b5   : > { %s1321_s13 = scalar_lea.vmem %s1320_s12, 256  ;;  %p1322_p0 = scmp.lt.s32.totalorder %s1059_s20, %s1320_s12 }
 0x5b6   : > { %p1317_p12 = pnand %p1316_p11, %p1464_p5  ;;  %p1323_p1 = scmp.lt.s32.totalorder %s1321_s13, %s1315_s9 }
 0x5b8   : > { %p1318_p13 = pneg %p1317_p12  ;;  %p1324_p2 = por %p1323_p1, %p1322_p0 }
 0x5ba   : > { %p1325_p3 = pnand %p1324_p2, %p1318_p13 }
 0x5bc   : > { %1328 = shalt.err (!%p1325_p3)
}
 0x5bd   : > { %s1329_s25 = scalar_lea.hbm %s1723_s19, 128  ;;  %s1333_s14 = scalar_lea.hbm %s1768_s6, 256 }
 0x5be   : > { %p1330_p4 = scmp.ne.s32.totalorder %s1723_s19, %s1329_s25  ;;  %p1334_p9 = scmp.lt.u32.totalorder %s1723_s19, %s1768_s6 }
 0x5bf   : > { %p1335_p10 = scmp.lt.u32.totalorder %s1333_s14, %s1329_s25  ;;  %p1337_p12 = scmp.lt.u32.totalorder %s1329_s25, %s1723_s19 }
 0x5c0   : > { %p1331_p7 = pnand %p1330_p4, %p1464_p5 }
 0x5c1   : > { %p1336_p11 = por %p1335_p10, %p1334_p9 }
 0x5c2   : > { %p1332_p8 = pneg %p1331_p7 }
 0x5c3   : > { %p1338_p13 = por %p1337_p12, %p1336_p11 }
 0x5c5   : > { %p1339_p0 = pnand %p1338_p13, %p1332_p8 }
 0x5c7   : > { %1342 = shalt.err (!%p1339_p0)
}
 0x5c8   : > { %1207 = dma.vmem_to_hbm [thread:$0]  (%p1464_p5), %s1059_s20, 128, %s1723_s19, %s1045_s28  }
 0x5c9 PF: > { %p1213_p1 = scmp.ge.s32.totalorder %s1377_s24, 2  ;;  %s1070_s15 = sand.u32 1, %s1365_s21  }
 0x5ca   : > { %s1071_s17 = scalar_lea.sflag [#allocation3], %s1070_s15 }
 0x5cb   : > { %p1210_p2 = pnand %p1213_p1, %p1468_p6 }
 0x5cd   : > { %1360 = dma.done.wait (!%p1210_p2), %s1071_s17, 128  }
 0x5ce   : > { %1362 = vsyncadd (!%p1210_p2), %s1071_s17, 4294967168  ;;  %p16_p3 = scmp.ge.s32.totalorder %s1451_s27, 4   ;;  %s1771_s21 = smov %s1369_s22 }
 0x5cf   : > { %s1772_s22 = smov %s1373_s23  ;;  %s1773_s23 = smov %s1462_s30 }
 0x5d0   : > { %s1774_s24 = smov %s1451_s27  ;;  %18 = sbr.rel (!%p16_p3) target bundleno = 3 (0x3), region = 82 }
 0x5d7   :  { %1076 = vsyncpa [#allocation3], 1 }
 0x5d8   :  { %1078 = vsyncpa [#allocation3 + $0x1], 1 }

</bundles_post_ra>
